<compile_context>
chip_gen: v7x
topology: tpu7x:2x2x1
jax: 0.10.0
libtpu: 0.0.40
codegen_flags: <defaults>
</compile_context>

<pallas_src>
import functools
import numpy as np
import jax
import jax.numpy as jnp
from jax import lax
from jax.experimental import pallas as pl
from jax.experimental.pallas import tpu as pltpu

_NEG_BIG = -1e30
_OUT_LANES = 128  # lane-dense MLP output slab width


def _round_up(x, m):
    return ((x + m - 1) // m) * m


def _vmem_budget_bytes():
    """~75% of physical VMEM (64 MiB v7x / 128 MiB v5e-v6e); safe fallback."""
    try:
        cap = int(pltpu.get_tpu_info().vmem_capacity_bytes)
    except Exception:
        cap = 64 * 1024 * 1024
    return cap * 3 // 4


def _pick_tile_e(E, N, budget=None):
    """Largest edge tile whose double-buffered (tile_e, N) bf16 one-hot tiles plus
    resident node tables / accumulators fit the per-chip VMEM budget."""
    if budget is None:
        budget = _vmem_budget_bytes()
    ru_n = max(_round_up(N, 128), 128)
    fixed = ru_n * 1024 + (2 << 20)          # resident gather table + merged accumulator + slack
    per_edge = 8 * ru_n + 4 * 128 * 4        # src+dst one-hot (bf16, 2 bufs) + lane-padded side streams
    t = max(16, (budget - fixed) // per_edge)
    t = min(t, 1024)                         # diminishing returns past ~512-1024 (0.35us/step overhead)
    t = min(t, _round_up(E, 16))
    return max(16, (t // 16) * 16)


def _split_bf16(x):
    """Exact hi/lo bf16 split along the last axis: value == bf16(hi) + bf16(lo)."""
    hi = x.astype(jnp.bfloat16)
    lo = (x - hi.astype(jnp.float32)).astype(jnp.bfloat16)
    return jnp.concatenate([hi, lo], axis=-1)


# ----------------------------------------------------------------------------
# Pallas kernels
# ----------------------------------------------------------------------------
def _gat_kernel(se_ref, src_oh_ref, dst_oh_ref, gtab_ref, selp_ref, mean_ref,
                out_ref, m_sc, nd_sc, *, alpha, concat):
    """One GAT layer, flash-style online softmax over destination nodes.

    gtab_ref : (N, 2*W1) bf16 hi/lo node table, W1 = 3H+HF, layout
               [s_src(H) | s_dst(H) | ones(H) | Wh(HF)] for hi then lo.
    selp_ref : (H, H+HF) = [I_H | head->HF broadcast]
    nd_sc    : (N, H+HF) merged [softmax denom | numerator] accumulator.
    """
    f32 = jnp.float32
    k = pl.program_id(0)
    H, C = selp_ref.shape            # C = H + HF
    W1 = gtab_ref.shape[1] // 2

    @pl.when(k == 0)
    def _init():
        m_sc[...] = jnp.full_like(m_sc, _NEG_BIG)
        nd_sc[...] = jnp.zeros_like(nd_sc)

    gtab = gtab_ref[...]                                                      # (N, 2*W1) bf16
    src_oh = src_oh_ref[...]                                                  # (tE, N) bf16
    dst_oh = dst_oh_ref[...]                                                  # (tE, N) bf16
    selp = selp_ref[...]                                                      # (H, C)

    # One bf16 MXU pass per side gathers scores AND messages; hi+lo recombine
    # in f32 (one-hot rows are exact in bf16 -> gather is exact to ~2^-17).
    gs2 = jnp.dot(src_oh, gtab, preferred_element_type=f32)                   # (tE, 2*W1)
    gd2 = jnp.dot(dst_oh, gtab, preferred_element_type=f32)                   # (tE, 2*W1)
    g_s = gs2[:, :W1] + gs2[:, W1:]                                           # (tE, W1)
    g_d = gd2[:, :W1] + gd2[:, W1:]

    # per-edge attention scores (edge-feature term precomputed outside)
    score = g_s[:, 0:H] + g_d[:, H:2 * H] + se_ref[...]                       # (tE, H)
    score = jnp.where(score > 0, score, alpha * score)                        # LeakyReLU

    # online (flash-style) rescale of the per-node softmax accumulators
    m_old = m_sc[...]                                                         # (1, H)
    m_new = jnp.maximum(m_old, jnp.max(score, axis=0, keepdims=True))
    rescale = jnp.exp(m_old - m_new)                                          # (1, H)
    m_sc[...] = m_new

    p = jnp.exp(score - m_new)                                                # (tE, H)
    onewh = g_s[:, 2 * H:]                                                    # (tE, C) = [1 | Wh_src]
    payload = jnp.dot(p, selp, preferred_element_type=f32) * onewh            # (tE, C) = [p | p*Wh_src]
    ph32 = payload.astype(jnp.bfloat16).astype(f32)
    pl2 = jnp.concatenate([payload, payload - ph32], axis=-1).astype(jnp.bfloat16)  # exact hi/lo split

    # ONE scatter-add over destination nodes for denom+numerator (edge axis contracted,
    # no transposed copy of dst_oh is built).
    contrib2 = lax.dot_general(dst_oh, pl2, (((0,), (0,)), ((), ())),
                               preferred_element_type=f32)                    # (N, 2C)
    contrib = contrib2[:, :C] + contrib2[:, C:]                               # (N, C)
    resc = jnp.dot(rescale, selp, preferred_element_type=f32)                 # (1, C)
    nd_sc[...] = nd_sc[...] * resc + contrib

    @pl.when(k == pl.num_programs(0) - 1)
    def _finalize():
        nd = nd_sc[...]
        # reciprocal on the (N,H) node array (not the (E,H) edge array); guard
        # zero-in-degree nodes (denom==0 -> h_new==0, like segment_sum).
        inv = 1.0 / jnp.maximum(nd[:, :H], 1e-30)                             # (N, H)
        h_new = nd[:, H:] * jnp.dot(inv, selp, preferred_element_type=f32)[:, H:]  # (N, HF)
        if concat:
            out_ref[...] = jnp.where(h_new > 0, h_new,
                                     jnp.exp(jnp.minimum(h_new, 0.0)) - 1.0)  # ELU (clamped)
        else:
            out_ref[...] = jnp.dot(h_new, mean_ref[...], preferred_element_type=f32)


def _edge_mlp_kernel(e1_ref, src_oh_ref, dst_oh_ref, tab_ref, w2_ref, b2_ref,
                     out_ref):
    """Edge MLP: z = relu(h1s[src] + h1d[dst] + (e@w1_e + b1)); logits = z@w2 + b2.
    tab_ref is the hi/lo bf16 split of [h@w1_src | h@w1_dst] (folded outside)."""
    f32 = jnp.float32
    hid = w2_ref.shape[0]
    W1 = tab_ref.shape[1] // 2                                                # = 2*hid
    tab = tab_ref[...]                                                        # (N, 2*W1) bf16
    gs2 = jnp.dot(src_oh_ref[...], tab, preferred_element_type=f32)           # (tE, 2*W1)
    gd2 = jnp.dot(dst_oh_ref[...], tab, preferred_element_type=f32)
    g_s = gs2[:, :W1] + gs2[:, W1:]
    g_d = gd2[:, :W1] + gd2[:, W1:]
    z = jnp.maximum(g_s[:, :hid] + g_d[:, hid:] + e1_ref[...], 0.0)           # (tE, hid)
    # lane-dense output slab: w2/b2 zero-padded to 128 lanes, column 0 is the logit
    out_ref[...] = jnp.dot(z, w2_ref[...], preferred_element_type=f32) + b2_ref[...]


# ----------------------------------------------------------------------------
# Wrappers
# ----------------------------------------------------------------------------
def gat_layer_pallas(h, se, src_oh, dst_oh, layer, tile_e, vmem_limit):
    f32 = jnp.float32
    N = h.shape[0]
    H, F = layer["num_heads"], layer["out_feats"]
    HF = H * F
    C = H + HF
    W1 = 3 * H + HF
    concat = layer["concat"]
    out_dim = HF if concat else F
    E_pad = se.shape[0]
    n_tiles = E_pad // tile_e

    # Node-side projections + exact hi/lo bf16 gather table, built once in XLA
    # (tiny: (N, 2*W1) bf16), then resident in VMEM for all edge tiles.
    wh = jnp.dot(h, layer["W"], preferred_element_type=f32)                   # (N, HF)
    tab = jnp.concatenate([wh @ layer["A_src"], wh @ layer["A_dst"],
                           jnp.ones((N, H), f32), wh], axis=1)                # (N, W1)
    gtab = _split_bf16(tab)                                                   # (N, 2*W1) bf16

    kernel = functools.partial(_gat_kernel, alpha=layer["alpha"], concat=concat)
    return pl.pallas_call(
        kernel,
        out_shape=jax.ShapeDtypeStruct((N, out_dim), f32),
        grid_spec=pltpu.PrefetchScalarGridSpec(
            num_scalar_prefetch=0,
            grid=(n_tiles,),
            in_specs=[
                pl.BlockSpec((tile_e, H), lambda k: (k, 0)),       # e @ (We a_edge) (tiled)
                pl.BlockSpec((tile_e, N), lambda k: (k, 0)),       # src one-hot (bf16, tiled)
                pl.BlockSpec((tile_e, N), lambda k: (k, 0)),       # dst one-hot (bf16, tiled)
                pl.BlockSpec((N, 2 * W1), lambda k: (0, 0)),       # hi/lo node table (resident)
                pl.BlockSpec((H, C), lambda k: (0, 0)),            # [I_H | head-broadcast]
                pl.BlockSpec((HF, F), lambda k: (0, 0)),           # head-mean matrix
            ],
            out_specs=pl.BlockSpec((N, out_dim), lambda k: (0, 0)),
            scratch_shapes=[
                pltpu.VMEM((1, H), f32),     # running per-head max
                pltpu.VMEM((N, C), f32),     # merged [denom | numerator] accumulator
            ]),
        compiler_params=pltpu.CompilerParams(
            dimension_semantics=("arbitrary",),          # sequential accumulation over edge tiles
            vmem_limit_bytes=vmem_limit),
    )(se, src_oh, dst_oh, gtab, layer["selp"], layer["mean_mat"])


def edge_mlp_pallas(h, e1, src_oh, dst_oh, mlp, tile_e, vmem_limit):
    f32 = jnp.float32
    N = h.shape[0]
    hid = mlp["w2_pad"].shape[0]
    E_pad = e1.shape[0]
    n_tiles = E_pad // tile_e

    # Fold w1_src/w1_dst onto the node features once (exact), hi/lo split for
    # bf16 gathers with f32-accurate recombination.
    tab = _split_bf16(jnp.concatenate([h @ mlp["w1_src"], h @ mlp["w1_dst"]],
                                      axis=1))                                # (N, 4*hid) bf16

    return pl.pallas_call(
        _edge_mlp_kernel,
        out_shape=jax.ShapeDtypeStruct((E_pad, _OUT_LANES), f32),
        grid_spec=pltpu.PrefetchScalarGridSpec(
            num_scalar_prefetch=0,
            grid=(n_tiles,),
            in_specs=[
                pl.BlockSpec((tile_e, hid), lambda k: (k, 0)),     # e @ w1_e + b1 (tiled)
                pl.BlockSpec((tile_e, N), lambda k: (k, 0)),       # src one-hot (bf16, tiled)
                pl.BlockSpec((tile_e, N), lambda k: (k, 0)),       # dst one-hot (bf16, tiled)
                pl.BlockSpec((N, 4 * hid), lambda k: (0, 0)),      # hi/lo node table (resident)
                pl.BlockSpec((hid, _OUT_LANES), lambda k: (0, 0)),
                pl.BlockSpec((1, _OUT_LANES), lambda k: (0, 0)),
            ],
            out_specs=pl.BlockSpec((tile_e, _OUT_LANES), lambda k: (k, 0)),
        ),
        compiler_params=pltpu.CompilerParams(
            dimension_semantics=("parallel",),           # independent edge tiles -> megacore on v7x
            vmem_limit_bytes=vmem_limit),
    )(e1, src_oh, dst_oh, tab, mlp["w2_pad"], mlp["b2_pad"])


def edge_classifier_forward(kparams, node_feats, edge_feats, src, dst, num_nodes,
                            tile_e=None):
    """Forward pass. `kparams` must come from prepare_params(). Eval mode (dropout=identity)."""
    E = src.shape[0]
    N = num_nodes
    if tile_e is None:
        tile_e = _pick_tile_e(E, N)
    tile_e = max(16, (tile_e // 16) * 16)
    tile_e = min(tile_e, _round_up(E, 16))
    E_pad = _round_up(E, tile_e)

    # one-hot incidence in bf16 (exact 0/1); padded edges are all-zero rows ->
    # they gather/scatter nothing and cannot pollute denominators/accumulators.
    src_oh = jax.nn.one_hot(src, N, dtype=jnp.bfloat16)
    dst_oh = jax.nn.one_hot(dst, N, dtype=jnp.bfloat16)
    e = edge_feats
    if E_pad != E:
        pad = E_pad - E
        src_oh = jnp.pad(src_oh, ((0, pad), (0, 0)))
        dst_oh = jnp.pad(dst_oh, ((0, pad), (0, 0)))
        e = jnp.pad(e, ((0, pad), (0, 0)))

    vmem_limit = _vmem_budget_bytes()
    h = node_feats
    for layer in kparams["layers"]:
        se = jnp.dot(e, layer["w_ea"])           # (E_pad, H) edge score term, folded outside
        h = gat_layer_pallas(h, se, src_oh, dst_oh, layer, tile_e, vmem_limit)
        # F.dropout(..., training=False) -> identity (eval mode).
    mlp = kparams["mlp"]
    e1 = jnp.dot(e, mlp["w1_e"]) + mlp["b1"]     # (E_pad, hid) edge term with bias folded in
    logits = edge_mlp_pallas(h, e1, src_oh, dst_oh, mlp, tile_e, vmem_limit)
    return logits[:E, 0]


# ----------------------------------------------------------------------------
# Parameter preparation (constants folded once, not per layer call)
# ----------------------------------------------------------------------------
def prepare_params(params):
    layers = []
    for lyr in params["layers"]:
        H, F = lyr["num_heads"], lyr["out_feats"]
        HF = H * F
        sel = jnp.repeat(jnp.eye(H, dtype=jnp.float32), F, axis=0)            # (HF, H)
        layers.append(dict(
            W=lyr["W"],                                                       # (Din, HF)
            A_src=sel * lyr["a_src"].reshape(HF, 1),                          # (HF, H)
            A_dst=sel * lyr["a_dst"].reshape(HF, 1),                          # (HF, H)
            w_ea=lyr["We"] @ (sel * lyr["a_edge"].reshape(HF, 1)),            # (De, H)
            selp=jnp.concatenate([jnp.eye(H, dtype=jnp.float32), sel.T],
                                 axis=1),                                     # (H, H+HF)
            mean_mat=jnp.tile(jnp.eye(F, dtype=jnp.float32), (H, 1)) / H,     # (HF, F)
            num_heads=H, out_feats=F, concat=lyr["concat"], alpha=lyr["alpha"],
        ))
    mlp = params["mlp"]
    hid = mlp["w2"].shape[0]
    w2_pad = jnp.zeros((hid, _OUT_LANES), jnp.float32).at[:, :1].set(mlp["w2"])
    b2_pad = jnp.zeros((1, _OUT_LANES), jnp.float32).at[:, :1].set(mlp["b2"])
    kmlp = dict(w1_src=mlp["w1_src"], w1_dst=mlp["w1_dst"], w1_e=mlp["w1_e"],
                b1=mlp["b1"], w2_pad=w2_pad, b2_pad=b2_pad)
    return dict(layers=layers, mlp=kmlp)


# ----------------------------------------------------------------------------
# Deterministic parameter init (xavier-uniform style, as in the module)
# ----------------------------------------------------------------------------
def _xavier(key, shape, fan_in, fan_out, gain=1.414):
    limit = gain * np.sqrt(6.0 / (fan_in + fan_out))
    return jax.random.uniform(key, shape, jnp.float32, -limit, limit)


def init_edge_classifier_params(key, in_feats, hidden, edge_feat_size, num_layers=3):
    configs = [dict(in_f=in_feats, H=4, F=hidden, concat=True)]
    for _ in range(num_layers - 2):
        configs.append(dict(in_f=hidden * 4, H=4, F=hidden, concat=True))
    configs.append(dict(in_f=hidden * 4, H=1, F=hidden, concat=False))

    layers = []
    for cfg in configs:
        key, k1, k2, k3, k4, k5 = jax.random.split(key, 6)
        H, F, in_f = cfg["H"], cfg["F"], cfg["in_f"]
        layers.append(dict(
            W=_xavier(k1, (in_f, H * F), in_f, H * F),
            We=_xavier(k2, (edge_feat_size, H * F), edge_feat_size, H * F),
            a_src=_xavier(k3, (H, F), F, H),
            a_dst=_xavier(k4, (H, F), F, H),
            a_edge=_xavier(k5, (H, F), F, H),
            num_heads=H, out_feats=F, concat=cfg["concat"], alpha=0.2,
        ))

    key, k1, k2, k3, k4 = jax.random.split(key, 5)
    d_in = 2 * hidden + edge_feat_size
    W1 = _xavier(k1, (d_in, hidden), d_in, hidden, gain=1.0)
    mlp = dict(
        w1_src=W1[:hidden], w1_dst=W1[hidden:2 * hidden], w1_e=W1[2 * hidden:],
        b1=_xavier(k2, (1, hidden), d_in, hidden, gain=1.0),
        w2=_xavier(k3, (hidden, 1), hidden, 1, gain=1.0),
        b2=_xavier(k4, (1, 1), hidden, 1, gain=1.0),
    )
    return dict(layers=layers, mlp=mlp)


# ----------------------------------------------------------------------------
# Pure-JAX reference (index-based gather / segment ops) for validation
# ----------------------------------------------------------------------------
def _gat_reference(h, e, src, dst, N, layer):
    H, F = layer["num_heads"], layer["out_feats"]
    Wh = (h @ layer["W"]).reshape(N, H, F)
    We = (e @ layer["We"]).reshape(-1, H, F)
    score = (jnp.einsum("ehf,hf->eh", Wh[src], layer["a_src"])
             + jnp.einsum("ehf,hf->eh", Wh[dst], layer["a_dst"])
             + jnp.einsum("ehf,hf->eh", We, layer["a_edge"]))
    score = jnp.where(score > 0, score, layer["alpha"] * score)
    m = jax.ops.segment_max(score, dst, num_segments=N)
    p = jnp.exp(score - m[dst])
    denom = jax.ops.segment_sum(p, dst, num_segments=N)
    a = p / denom[dst]
    h_new = jax.ops.segment_sum(Wh[src] * a[:, :, None], dst, num_segments=N)
    if layer["concat"]:
        h_new = h_new.reshape(N, H * F)
        return jnp.where(h_new > 0, h_new, jnp.exp(h_new) - 1.0)
    return h_new.mean(axis=1)


def edge_classifier_reference(params, node_feats, edge_feats, src, dst, N):
    h = node_feats
    for layer in params["layers"]:
        h = _gat_reference(h, edge_feats, src, dst, N, layer)
    mlp = params["mlp"]
    z = (h[src] @ mlp["w1_src"] + h[dst] @ mlp["w1_dst"]
         + edge_feats @ mlp["w1_e"] + mlp["b1"])
    z = jnp.maximum(z, 0.0)
    return (z @ mlp["w2"] + mlp["b2"])[:, 0]


# ----------------------------------------------------------------------------
if __name__ == "__main__":
    key = jax.random.PRNGKey(0)
    in_feats, hidden, edge_feat_size = 8, 8, 1
    params = init_edge_classifier_params(jax.random.fold_in(key, 99),
                                         in_feats, hidden, edge_feat_size,
                                         num_layers=3)
    kparams = prepare_params(params)

    # --- test 1: tiny graph, single edge tile -------------------------------
    N1, E1 = 8, 16
    k_src, k_dst, k_h, k_e = jax.random.split(jax.random.fold_in(key, 1), 4)
    src1 = jax.random.randint(k_src, (E1,), 0, N1)
    dst1 = jax.random.randint(k_dst, (E1,), 0, N1)
    nf1 = jax.random.normal(k_h, (N1, in_feats), jnp.float32)
    ef1 = jax.random.normal(k_e, (E1, edge_feat_size), jnp.float32)

    out1 = jax.block_until_ready(
        edge_classifier_forward(kparams, nf1, ef1, src1, dst1, N1))
    ref1 = edge_classifier_reference(params, nf1, ef1, src1, dst1, N1)
    assert out1.shape == (E1,)
    # hi/lo-split bf16 gathers keep ~f32 accuracy; tolerance covers 3-layer
    # softmax amplification of the residual split error.
    assert np.allclose(np.asarray(out1), np.asarray(ref1), rtol=1e-2, atol=1e-2), \
        "Pallas result mismatch vs reference (test 1)"

    # --- test 2: multi-tile edge grid with padding (exercises online softmax) --
    N2, E2 = 16, 42
    k_src, k_dst, k_h, k_e = jax.random.split(jax.random.fold_in(key, 2), 4)
    src2 = jax.random.randint(k_src, (E2,), 0, N2)
    dst2 = jax.random.randint(k_dst, (E2,), 0, N2)
    nf2 = jax.random.normal(k_h, (N2, in_feats), jnp.float32)
    ef2 = jax.random.normal(k_e, (E2, edge_feat_size), jnp.float32)

    out2 = jax.block_until_ready(
        edge_classifier_forward(kparams, nf2, ef2, src2, dst2, N2, tile_e=16))
    ref2 = edge_classifier_reference(params, nf2, ef2, src2, dst2, N2)
    assert out2.shape == (E2,)
    assert np.allclose(np.asarray(out2), np.asarray(ref2), rtol=1e-2, atol=1e-2), \
        "Pallas result mismatch vs reference (test 2)"

    print("KERNEL_OK")
</pallas_src>

<mosaic_0001>
module attributes {stable_mosaic.version = 11 : i64} {
  func.func @_gat_kernel(%arg0: i32, %arg1: memref<16x4xf32, #tpu.memory_space<vmem>>, %arg2: memref<16x8xbf16, #tpu.memory_space<vmem>>, %arg3: memref<16x8xbf16, #tpu.memory_space<vmem>>, %arg4: memref<8x88xbf16, #tpu.memory_space<vmem>>, %arg5: memref<4x36xf32, #tpu.memory_space<vmem>>, %arg6: memref<32x8xf32, #tpu.memory_space<vmem>>, %arg7: memref<8x32xf32, #tpu.memory_space<vmem>>, %arg8: memref<1x4xf32, #tpu.memory_space<vmem>>, %arg9: memref<8x36xf32, #tpu.memory_space<vmem>>) attributes {dimension_semantics = [#tpu.dimension_semantics<arbitrary>], iteration_bounds = array<i64: 1>, scalar_prefetch = 0 : i64, scratch_operands = 2 : i64, tpu.core_type = #tpu.core_type<tc>, window_params = [{transform_indices = @transform_0, window_bounds = array<i64: 16, 4>}, {transform_indices = @transform_1, window_bounds = array<i64: 16, 8>}, {transform_indices = @transform_2, window_bounds = array<i64: 16, 8>}, {pipeline_mode = #tpu.pipeline_mode<synchronous>, transform_indices = @transform_3, window_bounds = array<i64: 8, 88>}, {pipeline_mode = #tpu.pipeline_mode<synchronous>, transform_indices = @transform_4, window_bounds = array<i64: 4, 36>}, {pipeline_mode = #tpu.pipeline_mode<synchronous>, transform_indices = @transform_5, window_bounds = array<i64: 32, 8>}, {pipeline_mode = #tpu.pipeline_mode<synchronous>, transform_indices = @transform_6, window_bounds = array<i64: 8, 32>}]} {
    %c0_i32 = arith.constant 0 : i32
    %0 = arith.cmpi eq, %arg0, %c0_i32 : i32
    %1 = arith.extui %0 : i1 to i32
    %c0_i32_0 = arith.constant 0 : i32
    %2 = arith.cmpi ne, %1, %c0_i32_0 : i32
    scf.if %2 {
      %cst_27 = arith.constant -1.000000e+30 : f32
      %56 = vector.broadcast %cst_27 : f32 to vector<1x4xf32>
      %c0_28 = arith.constant 0 : index
      %c0_29 = arith.constant 0 : index
      %57 = vector.load %arg8[%c0_28, %c0_29] : memref<1x4xf32, #tpu.memory_space<vmem>>, vector<1x4xf32>
      tpu.vector_store %arg8[%c0_28, %c0_29], %56 {strides = array<i32>} : memref<1x4xf32, #tpu.memory_space<vmem>>, vector<1x4xf32>,
      %cst_30 = arith.constant 0.000000e+00 : f32
      %58 = vector.broadcast %cst_30 : f32 to vector<8x36xf32>
      %c0_31 = arith.constant 0 : index
      %c0_32 = arith.constant 0 : index
      %59 = vector.load %arg9[%c0_31, %c0_32] : memref<8x36xf32, #tpu.memory_space<vmem>>, vector<8x36xf32>
      tpu.vector_store %arg9[%c0_31, %c0_32], %58 {strides = array<i32>} : memref<8x36xf32, #tpu.memory_space<vmem>>, vector<8x36xf32>,
    } else {
    }
    %c0 = arith.constant 0 : index
    %c0_1 = arith.constant 0 : index
    %3 = vector.load %arg4[%c0, %c0_1] : memref<8x88xbf16, #tpu.memory_space<vmem>>, vector<8x88xbf16>
    %c0_2 = arith.constant 0 : index
    %c0_3 = arith.constant 0 : index
    %4 = vector.load %arg2[%c0_2, %c0_3] : memref<16x8xbf16, #tpu.memory_space<vmem>>, vector<16x8xbf16>
    %c0_4 = arith.constant 0 : index
    %c0_5 = arith.constant 0 : index
    %5 = vector.load %arg3[%c0_4, %c0_5] : memref<16x8xbf16, #tpu.memory_space<vmem>>, vector<16x8xbf16>
    %c0_6 = arith.constant 0 : index
    %c0_7 = arith.constant 0 : index
    %6 = vector.load %arg5[%c0_6, %c0_7] : memref<4x36xf32, #tpu.memory_space<vmem>>, vector<4x36xf32>
    %cst = arith.constant dense<0.000000e+00> : vector<16x88xf32>
    %7 = tpu.matmul %4, %3, %cst {dimension_numbers = #tpu.dot_dimension_numbers<[1], [0], [0], [1], [0, 0, 1, 1], [], []>} : vector<16x8xbf16>, vector<8x88xbf16>, vector<16x88xf32> -> vector<16x88xf32>
    %cst_8 = arith.constant dense<0.000000e+00> : vector<16x88xf32>
    %8 = tpu.matmul %5, %3, %cst_8 {dimension_numbers = #tpu.dot_dimension_numbers<[1], [0], [0], [1], [0, 0, 1, 1], [], []>} : vector<16x8xbf16>, vector<8x88xbf16>, vector<16x88xf32> -> vector<16x88xf32>
    %9 = vector.extract_strided_slice %7 {offsets = [0, 0], sizes = [16, 44], strides = [1, 1]} : vector<16x88xf32> to vector<16x44xf32>
    %10 = vector.extract_strided_slice %7 {offsets = [0, 44], sizes = [16, 44], strides = [1, 1]} : vector<16x88xf32> to vector<16x44xf32>
    %11 = arith.addf %9, %10 : vector<16x44xf32>
    %12 = vector.extract_strided_slice %8 {offsets = [0, 0], sizes = [16, 44], strides = [1, 1]} : vector<16x88xf32> to vector<16x44xf32>
    %13 = vector.extract_strided_slice %8 {offsets = [0, 44], sizes = [16, 44], strides = [1, 1]} : vector<16x88xf32> to vector<16x44xf32>
    %14 = arith.addf %12, %13 : vector<16x44xf32>
    %15 = vector.extract_strided_slice %11 {offsets = [0, 0], sizes = [16, 4], strides = [1, 1]} : vector<16x44xf32> to vector<16x4xf32>
    %16 = vector.extract_strided_slice %14 {offsets = [0, 4], sizes = [16, 4], strides = [1, 1]} : vector<16x44xf32> to vector<16x4xf32>
    %17 = arith.addf %15, %16 : vector<16x4xf32>
    %c0_9 = arith.constant 0 : index
    %c0_10 = arith.constant 0 : index
    %18 = vector.load %arg1[%c0_9, %c0_10] : memref<16x4xf32, #tpu.memory_space<vmem>>, vector<16x4xf32>
    %19 = arith.addf %17, %18 : vector<16x4xf32>
    %cst_11 = arith.constant 0.000000e+00 : f32
    %20 = vector.broadcast %cst_11 : f32 to vector<16x4xf32>
    %21 = arith.cmpf ogt, %19, %20 : vector<16x4xf32>
    %cst_12 = arith.constant 2.000000e-01 : f32
    %22 = vector.broadcast %cst_12 : f32 to vector<16x4xf32>
    %23 = arith.mulf %22, %19 : vector<16x4xf32>
    %24 = arith.select %21, %19, %23 : vector<16x4xi1>, vector<16x4xf32>
    %c0_13 = arith.constant 0 : index
    %c0_14 = arith.constant 0 : index
    %25 = vector.load %arg8[%c0_13, %c0_14] : memref<1x4xf32, #tpu.memory_space<vmem>>, vector<1x4xf32>
    %cst_15 = arith.constant dense<0xFF800000> : vector<4xf32>
    %26 = vector.multi_reduction <maximumf>, %24, %cst_15 [0] : vector<16x4xf32> to vector<4xf32>
    %27 = vector.shape_cast %26 : vector<4xf32> to vector<1x4xf32>
    %28 = arith.maximumf %25, %27 : vector<1x4xf32>
    %29 = arith.subf %25, %28 : vector<1x4xf32>
    %30 = math.exp %29 : vector<1x4xf32>
    %c0_16 = arith.constant 0 : index
    %c0_17 = arith.constant 0 : index
    %31 = vector.load %arg8[%c0_16, %c0_17] : memref<1x4xf32, #tpu.memory_space<vmem>>, vector<1x4xf32>
    tpu.vector_store %arg8[%c0_16, %c0_17], %28 {strides = array<i32>} : memref<1x4xf32, #tpu.memory_space<vmem>>, vector<1x4xf32>,
    %32 = vector.broadcast %28 : vector<1x4xf32> to vector<16x4xf32>
    %33 = arith.subf %24, %32 : vector<16x4xf32>
    %34 = math.exp %33 : vector<16x4xf32>
    %35 = vector.extract_strided_slice %11 {offsets = [0, 8], sizes = [16, 36], strides = [1, 1]} : vector<16x44xf32> to vector<16x36xf32>
    %cst_18 = arith.constant dense<0.000000e+00> : vector<16x36xf32>
    %36 = tpu.matmul %34, %6, %cst_18 {dimension_numbers = #tpu.dot_dimension_numbers<[1], [0], [0], [1], [0, 0, 1, 1], [], []>} : vector<16x4xf32>, vector<4x36xf32>, vector<16x36xf32> -> vector<16x36xf32>
    %37 = arith.mulf %36, %35 : vector<16x36xf32>
    %38 = arith.truncf %37 : vector<16x36xf32> to vector<16x36xbf16>
    %39 = arith.extf %38 : vector<16x36xbf16> to vector<16x36xf32>
    %40 = arith.subf %37, %39 : vector<16x36xf32>
    %41 = tpu.concatenate %37, %40 in 1 : vector<16x36xf32>, vector<16x36xf32> -> vector<16x72xf32>
    %42 = arith.truncf %41 : vector<16x72xf32> to vector<16x72xbf16>
    %cst_19 = arith.constant dense<0.000000e+00> : vector<8x72xf32>
    %43 = tpu.matmul %5, %42, %cst_19 {dimension_numbers = #tpu.dot_dimension_numbers<[0], [0], [1], [1], [0, 1, 1, 1], [], []>} : vector<16x8xbf16>, vector<16x72xbf16>, vector<8x72xf32> -> vector<8x72xf32>
    %44 = vector.extract_strided_slice %43 {offsets = [0, 0], sizes = [8, 36], strides = [1, 1]} : vector<8x72xf32> to vector<8x36xf32>
    %45 = vector.extract_strided_slice %43 {offsets = [0, 36], sizes = [8, 36], strides = [1, 1]} : vector<8x72xf32> to vector<8x36xf32>
    %46 = arith.addf %44, %45 : vector<8x36xf32>
    %cst_20 = arith.constant dense<0.000000e+00> : vector<1x36xf32>
    %47 = tpu.matmul %30, %6, %cst_20 {dimension_numbers = #tpu.dot_dimension_numbers<[1], [0], [0], [1], [0, 0, 1, 1], [], []>} : vector<1x4xf32>, vector<4x36xf32>, vector<1x36xf32> -> vector<1x36xf32>
    %c0_21 = arith.constant 0 : index
    %c0_22 = arith.constant 0 : index
    %48 = vector.load %arg9[%c0_21, %c0_22] : memref<8x36xf32, #tpu.memory_space<vmem>>, vector<8x36xf32>
    %49 = vector.broadcast %47 : vector<1x36xf32> to vector<8x36xf32>
    %50 = arith.mulf %48, %49 : vector<8x36xf32>
    %51 = arith.addf %50, %46 : vector<8x36xf32>
    %c0_23 = arith.constant 0 : index
    %c0_24 = arith.constant 0 : index
    %52 = vector.load %arg9[%c0_23, %c0_24] : memref<8x36xf32, #tpu.memory_space<vmem>>, vector<8x36xf32>
    tpu.vector_store %arg9[%c0_23, %c0_24], %51 {strides = array<i32>} : memref<8x36xf32, #tpu.memory_space<vmem>>, vector<8x36xf32>,
    %c0_i32_25 = arith.constant 0 : i32
    %53 = arith.cmpi eq, %arg0, %c0_i32_25 : i32
    %54 = arith.extui %53 : i1 to i32
    %c0_i32_26 = arith.constant 0 : i32
    %55 = arith.cmpi ne, %54, %c0_i32_26 : i32
    scf.if %55 {
      %c0_27 = arith.constant 0 : index
      %c0_28 = arith.constant 0 : index
      %56 = vector.load %arg9[%c0_27, %c0_28] : memref<8x36xf32, #tpu.memory_space<vmem>>, vector<8x36xf32>
      %57 = vector.extract_strided_slice %56 {offsets = [0, 0], sizes = [8, 4], strides = [1, 1]} : vector<8x36xf32> to vector<8x4xf32>
      %cst_29 = arith.constant 1.000000e-30 : f32
      %58 = vector.broadcast %cst_29 : f32 to vector<8x4xf32>
      %59 = arith.maximumf %57, %58 : vector<8x4xf32>
      %cst_30 = arith.constant 1.000000e+00 : f32
      %60 = vector.broadcast %cst_30 : f32 to vector<8x4xf32>
      %61 = arith.divf %60, %59 : vector<8x4xf32>
      %62 = vector.extract_strided_slice %56 {offsets = [0, 4], sizes = [8, 32], strides = [1, 1]} : vector<8x36xf32> to vector<8x32xf32>
      %cst_31 = arith.constant dense<0.000000e+00> : vector<8x36xf32>
      %63 = tpu.matmul %61, %6, %cst_31 {dimension_numbers = #tpu.dot_dimension_numbers<[1], [0], [0], [1], [0, 0, 1, 1], [], []>} : vector<8x4xf32>, vector<4x36xf32>, vector<8x36xf32> -> vector<8x36xf32>
      %64 = vector.extract_strided_slice %63 {offsets = [0, 4], sizes = [8, 32], strides = [1, 1]} : vector<8x36xf32> to vector<8x32xf32>
      %65 = arith.mulf %62, %64 : vector<8x32xf32>
      %cst_32 = arith.constant 0.000000e+00 : f32
      %66 = vector.broadcast %cst_32 : f32 to vector<8x32xf32>
      %67 = arith.cmpf ogt, %65, %66 : vector<8x32xf32>
      %cst_33 = arith.constant 0.000000e+00 : f32
      %68 = vector.broadcast %cst_33 : f32 to vector<8x32xf32>
      %69 = arith.minimumf %65, %68 : vector<8x32xf32>
      %70 = math.exp %69 : vector<8x32xf32>
      %cst_34 = arith.constant 1.000000e+00 : f32
      %71 = vector.broadcast %cst_34 : f32 to vector<8x32xf32>
      %72 = arith.subf %70, %71 : vector<8x32xf32>
      %73 = arith.select %67, %65, %72 : vector<8x32xi1>, vector<8x32xf32>
      %c0_35 = arith.constant 0 : index
      %c0_36 = arith.constant 0 : index
      %74 = vector.load %arg7[%c0_35, %c0_36] : memref<8x32xf32, #tpu.memory_space<vmem>>, vector<8x32xf32>
      tpu.vector_store %arg7[%c0_35, %c0_36], %73 {strides = array<i32>} : memref<8x32xf32, #tpu.memory_space<vmem>>, vector<8x32xf32>,
    } else {
    }
    return
  }
  func.func @transform_0(%arg0: i32) -> (i32, i32) {
    %c0_i32 = arith.constant 0 : i32
    %c0_i32_0 = arith.constant 0 : i32
    return %arg0, %c0_i32 : i32, i32
  }
  func.func @transform_1(%arg0: i32) -> (i32, i32) {
    %c0_i32 = arith.constant 0 : i32
    %c0_i32_0 = arith.constant 0 : i32
    return %arg0, %c0_i32 : i32, i32
  }
  func.func @transform_2(%arg0: i32) -> (i32, i32) {
    %c0_i32 = arith.constant 0 : i32
    %c0_i32_0 = arith.constant 0 : i32
    return %arg0, %c0_i32 : i32, i32
  }
  func.func @transform_3(%arg0: i32) -> (i32, i32) {
    %c0_i32 = arith.constant 0 : i32
    %c0_i32_0 = arith.constant 0 : i32
    %c0_i32_1 = arith.constant 0 : i32
    return %c0_i32, %c0_i32_0 : i32, i32
  }
  func.func @transform_4(%arg0: i32) -> (i32, i32) {
    %c0_i32 = arith.constant 0 : i32
    %c0_i32_0 = arith.constant 0 : i32
    %c0_i32_1 = arith.constant 0 : i32
    return %c0_i32, %c0_i32_0 : i32, i32
  }
  func.func @transform_5(%arg0: i32) -> (i32, i32) {
    %c0_i32 = arith.constant 0 : i32
    %c0_i32_0 = arith.constant 0 : i32
    %c0_i32_1 = arith.constant 0 : i32
    return %c0_i32, %c0_i32_0 : i32, i32
  }
  func.func @transform_6(%arg0: i32) -> (i32, i32) {
    %c0_i32 = arith.constant 0 : i32
    %c0_i32_0 = arith.constant 0 : i32
    %c0_i32_1 = arith.constant 0 : i32
    return %c0_i32, %c0_i32_0 : i32, i32
  }
}

</mosaic_0001>

<bundles_post_ra>
// kernel: tpu_custom_call.1
= control target key start
LH: loop header
LB: loop body
LE: loop exit
PB: predicated region body
PF: predicated region fallthrough
CT: control target
= control target key end

     0   :  { %vm48_vm0 = vcmask 1043456   ;;  %v686_v2 = vmov 0.0   ;;  %vm44_vm1 = vcmask 64512   ;;  %vm687_vm2 = vmmov 0   ;;  %s799_s0 = inlined_call_operand.vmem [shape: f32[16,4], index: 0, kind: input, shape index: {}]   ;;  %s800_s1 = inlined_call_operand.vmem [shape: bf16[16,8], index: 1, kind: input, shape index: {}]   ;;  %s801_s2 = inlined_call_operand.vmem [shape: bf16[16,8], index: 2, kind: input, shape index: {}]   ;;  %s802_s3 = inlined_call_operand.vmem [shape: bf16[8,88], index: 3, kind: input, shape index: {}]   ;;  %s803_s4 = inlined_call_operand.vmem [shape: f32[4,36], index: 4, kind: input, shape index: {}]   ;;  %s804_s5 = inlined_call_operand.vmem [shape: f32[32,8], index: 5, kind: input, shape index: {}]   ;;  %s805_s6 = inlined_call_operand.hbm [shape: f32[8,32], index: 6, kind: output, shape index: {}]  }
   0x1   :  { %v33_v0 = vld [vmem:[%s802_s3] sm:$0xf]  ;;  %602 = vmatprep.subr.bf16.mxu0 %v686_v2  ;;  %608 = vmatprep.subr.bf16.mxu1 %v686_v2 }
   0x2   :  { %v650_v1 = vld [vmem:[%s800_s1] sm:$0xff]   ;;  %v50_v3 = vsel %vm48_vm0, %v33_v0, 0  ;;  %604 = vmatprep.mubr.msk.bf16.mxu0 %vm687_vm2, %v686_v2  ;;  %610 = vmatprep.mubr.msk.bf16.mxu1 %vm687_vm2, %v686_v2 }
   0x3   :  { %603 = vmatpush3.bf16.msra.mxu0 %v50_v3  ;;  %609 = vmatpush3.bf16.msra.mxu1 %v50_v3  ;;  %v651_v4 = vld [vmem:[%s801_s2] sm:$0xff]  }
   0x4   :  { %11 = vsyncpa [#allocation5], 0  ;;  %619 = vmatprep.subr.bf16.mxu1 %v686_v2  ;;  %s688_s1 = smov 84   ;;  %vm29_vm3 = vcmask 24576   ;;  %v689_v13 = vmov -1e+30   ;;  %v200_v39 = vlaneseq }
   0x5   :  { %30 = vst.msk [vmem:[#allocation2] sm:$0x1] %vm29_vm3, %v689_v13  ;;  %s690_s2 = smov 124   ;;  %s691_s3 = smov 120   ;;  %v38_v22 = vld [vmem:[%s803_s4] sm:$0xf] }
   0x6   :  { %605 = vmatmul.mubr.msk.bf16.vlgmr.msra.gmra.mrb[0].mxu0 %vm44_vm1, %v650_v1  ;;  %611 = vmatmul.mubr.msk.bf16.vlgmr.msra.gmra.mrb[0].mxu1 %vm44_vm1, %v651_v4  ;;  %v172_v23 = vld [vmem:[%s799_s0] sm:$0xff]  ;;  %v173_v27 = vld [vmem:[%s799_s0 + $0x8] sm:$0xff]  ;;  %vm183_vm5 = vcmask 31744   ;;  %v766_v42 = vshrl.u32 %v200_v39, 7  ;;  %vm31_vm7 = vcmask 293888   ;;  %s692_s0 = smov 36  }
   0x7   :  { %621 = vmatprep.mubr.msk.bf16.mxu1 %vm687_vm2, %v686_v2  ;;  %614 = vmatprep.subr.msk.mxu0 %vm48_vm0, %v38_v22  ;;  %32 = vst.msk [vmem:[#allocation3] sm:$0xff] %vm31_vm7, %v686_v2  ;;  %vm339_vm8 = vcmask 130048   ;;  %s693_s4 = smov 92   ;;  %s694_s8 = smov [#allocation4]   ;;  %vm560_vm10 = vcmask 261120  }
   0x8   :  { %615 = vmatpush3.msk.msra.mxu0 %vm48_vm0, %v38_v22  ;;  %v202_v46 = vsub.s32 0, %v766_v42  ;;  %s568_s9 = sshll.u32 %s694_s8, 4  ;;  %s569_s9 = int_to_ptr.vmem [resolvable:$true] %s568_s9 }
   0x9   :  { %625 = vmatprep.subr.mxu0 %v686_v2  ;;  %s662_s10 = scalar_lea.vmem %s569_s9, 128  ;;  %p667_p1 = scmp.lt.s32.totalorder %s569_s9, %s569_s9 }
   0xa   :  { %p663_p0 = scmp.ne.s32.totalorder %s569_s9, %s662_s10  ;;  %p668_p2 = scmp.lt.s32.totalorder %s662_s10, %s662_s10 }
   0xc   :  { %v182_v45 = vld [vmem:[#allocation2] sm:$0x1]  ;;  %p669_p3 = por %p668_p2, %p667_p1 }
   0xe   :  { %p670_p4 = pnand %p669_p3, %p663_p0 }
  0xd9   :  { %v86_v5 = vpop.f32.mrb[0].mxu0  ;;  %v135_v6 = vpop.f32.mrb[0].mxu1 }
  0xda   :  { %154 = vrot.lane.b32.xlu0 %v135_v6, %s688_s1  ;;  %v612_v7 = vpop.f32.mrb[1].mxu1  ;;  %144 = vrot.lane.b32.xlu1 %v86_v5, %s688_s1  ;;  %v606_v8 = vpop.f32.mrb[1].mxu0 }
  0xdb   :  { %v138_v9 = vpop.f32.mrb[2].mxu1  ;;  %v89_v10 = vpop.f32.mrb[2].mxu0 }
  0xdc   :  { %v613_v11 = vpop.f32.mrb[3].mxu1  ;;  %v607_v12 = vpop.f32.mrb[3].mxu0 }
  0xde   :  { %156 = vrot.lane.b32.xlu0 %v138_v9, %s688_s1  ;;  %146 = vrot.lane.b32.xlu1 %v89_v10, %s688_s1 }
 0x14c   :  { %v155_v14 = vpop.permute.xlu0 %154  ;;  %v145_v15 = vpop.permute.xlu1 %144 }
 0x14d   :  { %v160_v16 = vadd.f32 %v155_v14, %v135_v6  ;;  %v150_v18 = vadd.f32 %v145_v15, %v86_v5 }
 0x14f   :  { %164 = vrot.lane.b32.xlu0 %v160_v16, %s690_s2 }
 0x150   :  { %v157_v17 = vpop.permute.xlu0 %156  ;;  %v147_v20 = vpop.permute.xlu1 %146 }
 0x151   :  { %v161_v19 = vadd.f32 %v157_v17, %v138_v9  ;;  %v151_v21 = vadd.f32 %v147_v20, %v89_v10 }
 0x153   :  { %297 = vrot.lane.b32.xlu0 %v150_v18, %s691_s3  ;;  %166 = vrot.lane.b32.xlu1 %v161_v19, %s690_s2 }
 0x157   :  { %299 = vrot.lane.b32.xlu1 %v151_v21, %s691_s3 }
 0x17a   :  { %323 = vxpose.xlu1.c.b16.start.end [1/1] (short) (narrow) %v651_v4, 16 }
 0x1c1   :  { %v165_v24 = vpop.permute.xlu0 %164 }
 0x1c2   :  { %v170_v25 = vadd.f32 %v165_v24, %v150_v18 }
 0x1c4   :  { %v174_v26 = vadd.f32 %v172_v23, %v170_v25 }
 0x1c5   :  { %v167_v28 = vpop.permute.xlu1 %166  ;;  %v298_v61 = vpop.permute.xlu0 %297 }
 0x1c6   :  { %v178_v29 = vmul.f32 0.2, %v174_v26  ;;  %v171_v30 = vadd.f32 %v167_v28, %v151_v21  ;;  %vm176_vm4 = vcmp.gt.f32.partialorder %v174_v26, 0.0  ;;  %v461_v21 = vld [vmem:[#allocation3] sm:$0xff] }
 0x1c8   :  { %v175_v31 = vadd.f32 %v173_v27, %v171_v30  ;;  %v180_v32 = vsel %vm176_vm4, %v174_v26, %v178_v29 }
 0x1c9   :  { %v184_v35 = vsel %vm183_vm5, %v180_v32, -inf  ;;  %v300_v59 = vpop.permute.xlu1 %299 }
 0x1ca   :  { %vm177_vm6 = vcmp.gt.f32.partialorder %v175_v31, 0.0  ;;  %v179_v33 = vmul.f32 0.2, %v175_v31 }
 0x1cc   :  { %v181_v34 = vsel %vm177_vm6, %v175_v31, %v179_v33 }
 0x1cd   :  { %v185_v36 = vsel %vm183_vm5, %v181_v34, -inf }
 0x1ce   :  { %v186_v37 = vmax.f32 %v184_v35, %v185_v36 }
 0x1d0   :  { %v187_v38 = vrot.slane %v186_v37, 4 }
 0x1d2   :  { %v188_v40 = vmax.f32 %v186_v37, %v187_v38 }
 0x1d4   :  { %v189_v41 = vrot.slane %v188_v40, 2 }
 0x1d6   :  { %v190_v43 = vmax.f32 %v188_v40, %v189_v41 }
 0x1d8   :  { %v191_v44 = vrot.slane %v190_v43, 1 }
 0x1da   :  { %v192_v47 = vmax.f32 %v190_v43, %v191_v44 }
 0x1dc   :  { %v193_v48 = vmax.f32 %v182_v45, %v192_v47 }
 0x1de   :  { %198 = vst.msk [vmem:[#allocation2] sm:$0x1] %vm29_vm3, %v193_v48  ;;  %v203_v49 = vrot.slane %v193_v48, %v202_v46  ;;  %v194_v52 = vsub.f32 %v182_v45, %v193_v48 }
 0x1e0   :  { %v205_v50 = vsub.f32 %v180_v32, %v203_v49  ;;  %v206_v51 = vsub.f32 %v181_v34, %v203_v49  ;;  %v195_v55 = vmul.f32 1.442695, %v194_v52  ;;  %v331_v15 = vpop.trf.xlu1 }
 0x1e2   :  { %v207_v53 = vmul.f32 1.442695, %v205_v50  ;;  %v209_v54 = vmul.f32 1.442695, %v206_v51 }
 0x1e4   :  { %652 = vpow2.f32 %v207_v53 }
 0x1e5   :  { %654 = vpow2.f32 %v209_v54 }
 0x1e6   :  { %656 = vpow2.f32 %v195_v55 }
 0x1ee   :  { %v653_v56 = vpop.eup %652 }
 0x1ef   :  { %v655_v57 = vpop.eup %654  ;;  %616 = vmatprep.mubr.msk.f32.mxu0 %vm183_vm5, %v653_v56 }
 0x1f0   :  { %617 = vmatmul.mubr.msk.f32.vlgmr.msra.gmra.mrb[4].mxu0 %vm183_vm5, %v655_v57  ;;  %v657_v58 = vpop.eup %656 }
 0x1f1   :  { %626 = vmatpush3.msk.msra.mxu0 %vm48_vm0, %v38_v22  ;;  %627 = vmatprep.mubr.msk.f32.mxu0 %vm687_vm2, %v686_v2 }
 0x1f2   :  { %630 = vmatprep.subr.mxu0 %v686_v2 }
 0x1f4   :  { %628 = vmatmul.mubr.msk.f32.vlgmr.msra.gmra.mrb[6].mxu0 %vm183_vm5, %v657_v58 }
 0x1f5   :  { %631 = vmatpush3.msk.msra.mxu0 %vm48_vm0, %v38_v22  ;;  %632 = vmatprep.mubr.msk.f32.mxu0 %vm687_vm2, %v686_v2 }
 0x2c3   :  { %v618_v60 = vpop.f32.mrb[4].mxu0 }
 0x2c4   :  { %v304_v62 = vmul.f32 %v618_v60, %v300_v59  ;;  %v286_v63 = vpop.f32.mrb[5].mxu0 }
 0x2c5   :  { %v303_v0 = vmul.f32 %v298_v61, %v286_v63 }
 0x2c7   :  { %v305_v1 = vpack.c.bf16 %v304_v62, %v303_v0  ;;  %v457_v3 = vpop.f32.mrb[6].mxu0 }
 0x2c8   :  { %v629_v4 = vpop.f32.mrb[7].mxu0  ;;  %v465_v20 = vrot.slane %v457_v3, %v202_v46 }
 0x2c9   :  { %v306_v5 = vunpack.c.l.bf16 %v305_v1  ;;  %v307_v6 = vunpack.c.h.bf16 %v305_v1 }
 0x2ca   :  { %v466_v23 = vmul.f32 %v465_v20, %v461_v21 }
 0x2cb   :  { %v308_v7 = vsub.f32 %v303_v0, %v306_v5  ;;  %v309_v8 = vsub.f32 %v304_v62, %v307_v6 }
 0x2cd   :  { %v645_v9 = vpack.i.bf16 %v309_v8, %v308_v7 }
 0x2cf   :  { %646 = vrot.lane.b32.xlu0 %v645_v9, %s692_s0 }
 0x341   :  { %v647_v10 = vpop.permute.xlu0 %646 }
 0x342   :  { %v649_v11 = vunpack.i.h.bf16 %v647_v10  ;;  %v648_v12 = vunpack.i.l.bf16 %v647_v10 }
 0x344   :  { %v320_v2 = vsel %vm31_vm7, %v304_v62, %v649_v11  ;;  %v319_v13 = vsel %vm31_vm7, %v303_v0, %v648_v12 }
 0x345   :  { %v321_v14 = vpack.c.bf16 %v320_v2, %v319_v13 }
 0x347   :  { %620 = vmatpush3.bf16.msra.mxu1 %v321_v14 }
 0x34a   :  { %622 = vmatmul.mubr.msk.bf16.vlgmr.msra.gmra.mrb[4].mxu1 %vm339_vm8, %v331_v15 }
 0x41d   :  { %v377_v16 = vpop.f32.mrb[4].mxu1 }
 0x41e   :  { %384 = vrot.lane.b32.xlu0 %v377_v16, %s693_s4  ;;  %v623_v17 = vpop.f32.mrb[5].mxu1 }
 0x41f   :  { %v380_v18 = vpop.f32.mrb[6].mxu1 }
 0x420   :  { %v624_v19 = vpop.f32.mrb[7].mxu1 }
 0x490   :  { %v385_v22 = vpop.permute.xlu0 %384 }
 0x491   :  { %v387_v24 = vadd.f32 %v385_v22, %v377_v16 }
 0x493   :  { %v467_v25 = vadd.f32 %v466_v23, %v387_v24 }
 0x495   :  { %468 = vst.msk [vmem:[#allocation3] sm:$0xff] %vm31_vm7, %v467_v25 }
 0x49c   :  { %v472_v26 = vld [vmem:[#allocation3] sm:$0xff] }
 0x49d   :  { %v473_v27 = vmax.f32 %v472_v26, 1e-30 }
 0x49f   :  { %658 = vrcp.f32 %v473_v27 }
 0x4a9   :  { %v659_v28 = vpop.eup %658 }
 0x4aa   :  { %633 = vmatmul.mubr.msk.f32.vlgmr.msra.gmra.mrb[8].mxu0 %vm183_vm5, %v659_v28 }
 0x57d   :  { %v545_v29 = vpop.f32.mrb[8].mxu0 }
 0x57e   :  { %v549_v30 = vmul.f32 %v545_v29, %v472_v26  ;;  %v634_v31 = vpop.f32.mrb[9].mxu0 }
 0x580   :  { %v551_v32 = vmin.f32 %v549_v30, 0.0  ;;  %vm550_vm9 = vcmp.gt.f32.partialorder %v549_v30, 0.0 }
 0x582   :  { %v552_v33 = vmul.f32 1.442695, %v551_v32 }
 0x584   :  { %660 = vpow2.f32 %v552_v33 }
 0x58e   :  { %v661_v34 = vpop.eup %660 }
 0x58f   :  { %v588_v35 = vadd.f32 -1.0, %v661_v34 }
 0x591   :  { %v555_v36 = vsel %vm550_vm9, %v549_v30, %v588_v35 }
 0x592   :  { %557 = vrot.lane.b32.xlu0 %v555_v36, %s690_s2 }
 0x604   :  { %v558_v37 = vpop.permute.xlu0 %557 }
 0x605   :  { %561 = vst.msk [vmem:[#allocation4] sm:$0xff] %vm560_vm10, %v558_v37 }
 0x606   :  { %673 = shalt.err (!%p670_p4)
}
 0x607   :  { %s674_s13 = scalar_lea.hbm %s805_s6, 128 }
 0x608   :  { %p675_p5 = scmp.ne.s32.totalorder %s805_s6, %s674_s13  ;;  %p678_p6 = scmp.lt.u32.totalorder %s674_s13, %s805_s6 }
 0x60a   :  { %p680_p7 = pnand %p678_p6, %p675_p5 }
 0x60c   :  { %683 = shalt.err (!%p680_p7)
}
 0x60d   :  { %571 = dma.vmem_to_hbm [thread:$0]  %s569_s9, 128, %s805_s6, [#allocation5]  }
 0x60e   :  { %684 = dma.done.wait [#allocation5], 128  }
 0x60f   :  { %685 = vsyncadd [#allocation5], 4294967168 }
 0x610   :  { %575 = vsyncpa [#allocation5], 1 }

</bundles_post_ra>
